<compile_context>
chip_gen: v7x
topology: tpu7x:2x2x1
jax: 0.10.0
libtpu: 0.0.40
codegen_flags: <defaults>
</compile_context>

<pallas_src>
import math

import jax
import jax.numpy as jnp
from jax.experimental import pallas as pl
from jax.experimental.pallas import tpu as pltpu


_NEG_INF = -1e30                       # finite mask sentinel; avoids inf-inf -> NaN
_VMEM_BUDGET = 12 * 1024 * 1024        # conservative working-set target (fits v5e default)
_VMEM_LIMIT_FLOOR = 32 * 1024 * 1024
_VMEM_LIMIT_CAP = 64 * 1024 * 1024     # v7x has 64 MiB physical VMEM per TensorCore


def _round_up(x, m):
    return ((x + m - 1) // m) * m


def _pick_tile(n, preferred):
    """Largest preferred tile that divides n; fall back to the full dim (legal block)."""
    for t in preferred:
        if n >= t and n % t == 0:
            return t
    return n


def _vmem_limit_bytes(estimate):
    return int(min(_VMEM_LIMIT_CAP, max(_VMEM_LIMIT_FLOOR, 2 * estimate)))


# ----------------------- fused QKV projection kernel -----------------------
# Three contiguous (M, A) outputs + K-reduction grid axis (VMEM bounded in E).

def _qkv_proj_kernel(x_ref, wq_ref, wk_ref, wv_ref, q_ref, k_ref, v_ref,
                     accq, acck, accv):
    kstep = pl.program_id(1)

    @pl.when(kstep == 0)
    def _init():
        accq[...] = jnp.zeros_like(accq)
        acck[...] = jnp.zeros_like(acck)
        accv[...] = jnp.zeros_like(accv)

    x = x_ref[...]
    accq[...] += jnp.dot(x, wq_ref[...], preferred_element_type=jnp.float32)
    acck[...] += jnp.dot(x, wk_ref[...], preferred_element_type=jnp.float32)
    accv[...] += jnp.dot(x, wv_ref[...], preferred_element_type=jnp.float32)

    @pl.when(kstep == pl.num_programs(1) - 1)
    def _finalize():
        q_ref[...] = accq[...].astype(q_ref.dtype)
        k_ref[...] = acck[...].astype(k_ref.dtype)
        v_ref[...] = accv[...].astype(v_ref.dtype)


def _qkv_projection(x_flat, wq, wk, wv, out_dtype):
    m, e = x_flat.shape
    a = wq.shape[1]
    itemsize = jnp.dtype(out_dtype).itemsize

    tm = _pick_tile(m, (512, 256, 128, 64, 32, 16, 8))
    tk = _pick_tile(e, (512, 256, 128))  # reduction tile over E; full E if small/awkward

    def est(tm_, tk_):
        io = 2 * (tm_ * tk_ + 3 * tk_ * a) * itemsize   # double-buffered x + weights
        out = 2 * 3 * tm_ * a * itemsize                # double-buffered outputs
        scratch = 3 * tm_ * a * 4                       # f32 accumulators
        return io + out + scratch

    while tm > 8 and est(tm, tk) > _VMEM_BUDGET:
        tm //= 2

    grid = (m // tm, e // tk)
    out_sds = jax.ShapeDtypeStruct((m, a), out_dtype)

    return pl.pallas_call(
        _qkv_proj_kernel,
        out_shape=(out_sds, out_sds, out_sds),
        grid_spec=pltpu.PrefetchScalarGridSpec(
            num_scalar_prefetch=0,
            grid=grid,
            in_specs=[
                pl.BlockSpec((tm, tk), lambda i, kk: (i, kk)),
                pl.BlockSpec((tk, a), lambda i, kk: (kk, 0)),
                pl.BlockSpec((tk, a), lambda i, kk: (kk, 0)),
                pl.BlockSpec((tk, a), lambda i, kk: (kk, 0)),
            ],
            out_specs=[
                pl.BlockSpec((tm, a), lambda i, kk: (i, 0)),
                pl.BlockSpec((tm, a), lambda i, kk: (i, 0)),
                pl.BlockSpec((tm, a), lambda i, kk: (i, 0)),
            ],
            scratch_shapes=[pltpu.VMEM((tm, a), jnp.float32)] * 3,
        ),
        compiler_params=pltpu.CompilerParams(
            dimension_semantics=("parallel", "arbitrary"),
            vmem_limit_bytes=_vmem_limit_bytes(est(tm, tk)),
        ),
    )(x_flat, wq, wk, wv)


# ----------------------- flash-style causal attention -----------------------
# Grid = (B, n_triangular_steps); qi[]/kv[] are scalar-prefetched SMEM arrays so
# only lower-triangular tiles get grid steps. tq == tkv by construction, so the
# diagonal mask uses local iota only and off-diagonal tiles pay no mask at all.

def _flash_attn_kernel(qi_ids_ref, kv_ids_ref, q_ref, k_ref, v_ref, o_ref,
                       m_scr, l_scr, acc_scr):
    step = pl.program_id(1)
    qi = qi_ids_ref[step]
    kv = kv_ids_ref[step]

    @pl.when(kv == 0)  # first kv tile of this q-tile's group
    def _init():
        m_scr[...] = jnp.full_like(m_scr, _NEG_INF)
        l_scr[...] = jnp.zeros_like(l_scr)
        acc_scr[...] = jnp.zeros_like(acc_scr)

    q = q_ref[0]  # (tile, A) compute dtype (bf16 by default)
    k = k_ref[0]  # (tile, A)
    # scores = q @ k^T with the transpose folded into the contraction
    # (1/sqrt(A) is already folded into Wq in the wrapper).
    s = jax.lax.dot_general(
        q, k,
        dimension_numbers=(((1,), (1,)), ((), ())),
        preferred_element_type=jnp.float32,
    )  # (tile, tile) f32

    def _update(scores):
        # Online softmax update (all softmax math stays in f32).
        m_prev = m_scr[...]
        m_new = jnp.maximum(m_prev, jnp.max(scores, axis=-1, keepdims=True))
        alpha = jnp.exp(m_prev - m_new)
        p = jnp.exp(scores - m_new)
        l_scr[...] = alpha * l_scr[...] + jnp.sum(p, axis=-1, keepdims=True)
        acc_scr[...] = alpha * acc_scr[...] + jnp.dot(
            p.astype(v_ref.dtype), v_ref[0], preferred_element_type=jnp.float32)
        m_scr[...] = m_new

    @pl.when(kv < qi)  # fully-unmasked tile: no iota / compare / select
    def _off_diag():
        _update(s)

    @pl.when(kv == qi)  # diagonal tile: mask + finalize (last step of this q tile)
    def _diag_and_finalize():
        tq, tkv = s.shape
        # tq == tkv and qi == kv, so global row/col offsets cancel: local iota only.
        row = jax.lax.broadcasted_iota(jnp.int32, (tq, tkv), 0)
        col = jax.lax.broadcasted_iota(jnp.int32, (tq, tkv), 1)
        _update(jnp.where(col > row, _NEG_INF, s))
        inv_l = pl.reciprocal(l_scr[...], approx=True)  # EUP slot, not VALU divide
        o_ref[0] = (acc_scr[...] * inv_l).astype(o_ref.dtype)


def _attn_vmem_estimate(tile, a, itemsize):
    io = 2 * 3 * tile * a * itemsize      # double-buffered q/k/v blocks
    out = 2 * tile * a * 4                # double-buffered out block (<= f32)
    scratch = (tile * a + 2 * tile) * 4   # f32 acc + m + l
    score = 2 * tile * tile * 4           # scores + exp intermediates (rough)
    return io + out + scratch + score


def _choose_seq_tile(t):
    if t % 512 == 0:
        return 512
    if t % 256 == 0:
        return 256
    if t >= 256:
        return 256
    if t >= 128:
        return 128
    return _round_up(t, 8)   # tiny sequences: one tile, padded to a sublane multiple


def single_head_attention(embedded, wq, wk, wv, *,
                          compute_dtype=jnp.bfloat16, seq_tile=None):
    """embedded: (B, T, E); wq/wk/wv: (E, A) -> (B, T, A) in embedded.dtype."""
    b, t, e = embedded.shape
    a = wq.shape[1]
    out_dtype = embedded.dtype
    itemsize = jnp.dtype(compute_dtype).itemsize

    if seq_tile is None:
        tile = _choose_seq_tile(t)
        while tile > 128 and _attn_vmem_estimate(tile, a, itemsize) > _VMEM_BUDGET:
            tile //= 2
    else:
        assert seq_tile % 8 == 0, "seq_tile must be a multiple of 8 (sublane)"
        tile = seq_tile

    # Pad T to a tile multiple. Padded K/V columns are always above the causal
    # diagonal for real rows, so zero padding never leaks; padded rows are sliced off.
    t_pad = _round_up(t, tile)
    x = embedded
    if t_pad != t:
        x = jnp.pad(x, ((0, 0), (0, t_pad - t), (0, 0)))

    scale = 1.0 / math.sqrt(a)
    x_flat = x.reshape(b * t_pad, e).astype(compute_dtype)
    q, k, v = _qkv_projection(
        x_flat,
        (wq * scale).astype(compute_dtype),   # fold 1/sqrt(A) into Wq
        wk.astype(compute_dtype),
        wv.astype(compute_dtype),
        compute_dtype,
    )
    q = q.reshape(b, t_pad, a)
    k = k.reshape(b, t_pad, a)
    v = v.reshape(b, t_pad, a)

    # Triangular enumeration of contributing (q-tile, kv-tile) pairs.
    n_t = t_pad // tile
    qi_list, kv_list = [], []
    for qi in range(n_t):
        for kvi in range(qi + 1):
            qi_list.append(qi)
            kv_list.append(kvi)
    qi_ids = jnp.asarray(qi_list, dtype=jnp.int32)
    kv_ids = jnp.asarray(kv_list, dtype=jnp.int32)
    n_steps = len(qi_list)

    def q_map(bi, s, qi_r, kv_r):
        return (bi, qi_r[s], 0)

    def kv_map(bi, s, qi_r, kv_r):
        return (bi, kv_r[s], 0)

    est = _attn_vmem_estimate(tile, a, itemsize)
    # Note: step axis is the flash reduction -> "arbitrary"; only B is "parallel".
    out = pl.pallas_call(
        _flash_attn_kernel,
        out_shape=jax.ShapeDtypeStruct((b, t_pad, a), out_dtype),
        grid_spec=pltpu.PrefetchScalarGridSpec(
            num_scalar_prefetch=2,
            grid=(b, n_steps),
            in_specs=[
                pl.BlockSpec((1, tile, a), q_map),
                pl.BlockSpec((1, tile, a), kv_map),
                pl.BlockSpec((1, tile, a), kv_map),
            ],
            out_specs=pl.BlockSpec((1, tile, a), q_map),
            scratch_shapes=[
                pltpu.VMEM((tile, 1), jnp.float32),   # running max m
                pltpu.VMEM((tile, 1), jnp.float32),   # running denom l
                pltpu.VMEM((tile, a), jnp.float32),   # output accumulator
            ],
        ),
        compiler_params=pltpu.CompilerParams(
            dimension_semantics=("parallel", "arbitrary"),
            vmem_limit_bytes=_vmem_limit_bytes(est),
        ),
    )(qi_ids, kv_ids, q, k, v)

    if t_pad != t:
        out = out[:, :t, :]
    return out


# ----------------------- pure-JAX reference -----------------------

def _reference(embedded, wq, wk, wv):
    q = embedded @ wq
    k = embedded @ wk
    v = embedded @ wv
    a = wq.shape[1]
    scores = jnp.einsum("btd,bsd->bts", q, k) / (a ** 0.5)
    t = embedded.shape[1]
    mask = jnp.tril(jnp.ones((t, t), dtype=bool))
    scores = jnp.where(mask[None], scores, -jnp.inf)
    probs = jax.nn.softmax(scores, axis=-1)
    return probs @ v


if __name__ == "__main__":
    # Small shapes consistent with the module's forward: (batch, seq, embedding_dim)
    B, T, E, A = 2, 8, 32, 16

    key = jax.random.PRNGKey(0)
    key_x, key_q, key_k, key_v = jax.random.split(key, 4)

    embedded = jax.random.normal(key_x, (B, T, E), dtype=jnp.float32)
    # Deterministic init mimicking nn.Linear default: U(-1/sqrt(E), 1/sqrt(E))
    bound = 1.0 / math.sqrt(E)
    wq = jax.random.uniform(key_q, (E, A), jnp.float32, -bound, bound)
    wk = jax.random.uniform(key_k, (E, A), jnp.float32, -bound, bound)
    wv = jax.random.uniform(key_v, (E, A), jnp.float32, -bound, bound)

    ref = _reference(embedded, wq, wk, wv)

    # Default path: bf16 MXU operands, f32 accumulation + f32 softmax.
    out = jax.block_until_ready(single_head_attention(embedded, wq, wk, wv))
    assert out.shape == (B, T, A)
    assert jnp.allclose(out, ref, atol=2e-2, rtol=2e-2), "bf16 path mismatch vs reference"

    # Full f32 compute path (same kernels, f32 operands).
    out_f32 = jax.block_until_ready(
        single_head_attention(embedded, wq, wk, wv, compute_dtype=jnp.float32))
    assert jnp.allclose(out_f32, ref, atol=2e-2, rtol=2e-2), "f32 path mismatch vs reference"

    # Multi-tile path: triangular grid, off-diagonal (unmasked) tiles, T padding.
    B2, T2 = 2, 40
    emb2 = jax.random.normal(jax.random.PRNGKey(1), (B2, T2, E), dtype=jnp.float32)
    ref2 = _reference(emb2, wq, wk, wv)
    out2 = jax.block_until_ready(
        single_head_attention(emb2, wq, wk, wv, seq_tile=16))
    assert out2.shape == (B2, T2, A)
    assert jnp.allclose(out2, ref2, atol=2e-2, rtol=2e-2), "multi-tile path mismatch"

    print("KERNEL_OK")
</pallas_src>

<mosaic_0001>
module attributes {stable_mosaic.version = 11 : i64} {
  func.func @_qkv_proj_kernel(%arg0: i32, %arg1: i32, %arg2: memref<16x32xbf16, #tpu.memory_space<vmem>>, %arg3: memref<32x16xbf16, #tpu.memory_space<vmem>>, %arg4: memref<32x16xbf16, #tpu.memory_space<vmem>>, %arg5: memref<32x16xbf16, #tpu.memory_space<vmem>>, %arg6: memref<16x16xbf16, #tpu.memory_space<vmem>>, %arg7: memref<16x16xbf16, #tpu.memory_space<vmem>>, %arg8: memref<16x16xbf16, #tpu.memory_space<vmem>>, %arg9: memref<16x16xf32, #tpu.memory_space<vmem>>, %arg10: memref<16x16xf32, #tpu.memory_space<vmem>>, %arg11: memref<16x16xf32, #tpu.memory_space<vmem>>) attributes {dimension_semantics = [#tpu.dimension_semantics<parallel>, #tpu.dimension_semantics<arbitrary>], iteration_bounds = array<i64: 1, 1>, scalar_prefetch = 0 : i64, scratch_operands = 3 : i64, tpu.core_type = #tpu.core_type<tc>, window_params = [{transform_indices = @transform_0, window_bounds = array<i64: 16, 32>}, {transform_indices = @transform_1, window_bounds = array<i64: 32, 16>}, {transform_indices = @transform_2, window_bounds = array<i64: 32, 16>}, {transform_indices = @transform_3, window_bounds = array<i64: 32, 16>}, {transform_indices = @transform_4, window_bounds = array<i64: 16, 16>}, {transform_indices = @transform_5, window_bounds = array<i64: 16, 16>}, {transform_indices = @transform_6, window_bounds = array<i64: 16, 16>}]} {
    %c0_i32 = arith.constant 0 : i32
    %0 = arith.cmpi eq, %arg1, %c0_i32 : i32
    %1 = arith.extui %0 : i1 to i32
    %c0_i32_0 = arith.constant 0 : i32
    %2 = arith.cmpi ne, %1, %c0_i32_0 : i32
    scf.if %2 {
      %cst_24 = arith.constant 0.000000e+00 : f32
      %22 = vector.broadcast %cst_24 : f32 to vector<16x16xf32>
      %c0_25 = arith.constant 0 : index
      %c0_26 = arith.constant 0 : index
      %23 = vector.load %arg9[%c0_25, %c0_26] : memref<16x16xf32, #tpu.memory_space<vmem>>, vector<16x16xf32>
      tpu.vector_store %arg9[%c0_25, %c0_26], %22 {strides = array<i32>} : memref<16x16xf32, #tpu.memory_space<vmem>>, vector<16x16xf32>,
      %cst_27 = arith.constant 0.000000e+00 : f32
      %24 = vector.broadcast %cst_27 : f32 to vector<16x16xf32>
      %c0_28 = arith.constant 0 : index
      %c0_29 = arith.constant 0 : index
      %25 = vector.load %arg10[%c0_28, %c0_29] : memref<16x16xf32, #tpu.memory_space<vmem>>, vector<16x16xf32>
      tpu.vector_store %arg10[%c0_28, %c0_29], %24 {strides = array<i32>} : memref<16x16xf32, #tpu.memory_space<vmem>>, vector<16x16xf32>,
      %cst_30 = arith.constant 0.000000e+00 : f32
      %26 = vector.broadcast %cst_30 : f32 to vector<16x16xf32>
      %c0_31 = arith.constant 0 : index
      %c0_32 = arith.constant 0 : index
      %27 = vector.load %arg11[%c0_31, %c0_32] : memref<16x16xf32, #tpu.memory_space<vmem>>, vector<16x16xf32>
      tpu.vector_store %arg11[%c0_31, %c0_32], %26 {strides = array<i32>} : memref<16x16xf32, #tpu.memory_space<vmem>>, vector<16x16xf32>,
    } else {
    }
    %c0 = arith.constant 0 : index
    %c0_1 = arith.constant 0 : index
    %3 = vector.load %arg2[%c0, %c0_1] : memref<16x32xbf16, #tpu.memory_space<vmem>>, vector<16x32xbf16>
    %c0_2 = arith.constant 0 : index
    %c0_3 = arith.constant 0 : index
    %4 = vector.load %arg9[%c0_2, %c0_3] : memref<16x16xf32, #tpu.memory_space<vmem>>, vector<16x16xf32>
    %c0_4 = arith.constant 0 : index
    %c0_5 = arith.constant 0 : index
    %5 = vector.load %arg3[%c0_4, %c0_5] : memref<32x16xbf16, #tpu.memory_space<vmem>>, vector<32x16xbf16>
    %cst = arith.constant dense<0.000000e+00> : vector<16x16xf32>
    %6 = tpu.matmul %3, %5, %cst {dimension_numbers = #tpu.dot_dimension_numbers<[1], [0], [0], [1], [0, 0, 1, 1], [], []>} : vector<16x32xbf16>, vector<32x16xbf16>, vector<16x16xf32> -> vector<16x16xf32>
    %7 = arith.addf %4, %6 : vector<16x16xf32>
    %c0_6 = arith.constant 0 : index
    %c0_7 = arith.constant 0 : index
    %8 = vector.load %arg9[%c0_6, %c0_7] : memref<16x16xf32, #tpu.memory_space<vmem>>, vector<16x16xf32>
    tpu.vector_store %arg9[%c0_6, %c0_7], %7 {strides = array<i32>} : memref<16x16xf32, #tpu.memory_space<vmem>>, vector<16x16xf32>,
    %c0_8 = arith.constant 0 : index
    %c0_9 = arith.constant 0 : index
    %9 = vector.load %arg10[%c0_8, %c0_9] : memref<16x16xf32, #tpu.memory_space<vmem>>, vector<16x16xf32>
    %c0_10 = arith.constant 0 : index
    %c0_11 = arith.constant 0 : index
    %10 = vector.load %arg4[%c0_10, %c0_11] : memref<32x16xbf16, #tpu.memory_space<vmem>>, vector<32x16xbf16>
    %cst_12 = arith.constant dense<0.000000e+00> : vector<16x16xf32>
    %11 = tpu.matmul %3, %10, %cst_12 {dimension_numbers = #tpu.dot_dimension_numbers<[1], [0], [0], [1], [0, 0, 1, 1], [], []>} : vector<16x32xbf16>, vector<32x16xbf16>, vector<16x16xf32> -> vector<16x16xf32>
    %12 = arith.addf %9, %11 : vector<16x16xf32>
    %c0_13 = arith.constant 0 : index
    %c0_14 = arith.constant 0 : index
    %13 = vector.load %arg10[%c0_13, %c0_14] : memref<16x16xf32, #tpu.memory_space<vmem>>, vector<16x16xf32>
    tpu.vector_store %arg10[%c0_13, %c0_14], %12 {strides = array<i32>} : memref<16x16xf32, #tpu.memory_space<vmem>>, vector<16x16xf32>,
    %c0_15 = arith.constant 0 : index
    %c0_16 = arith.constant 0 : index
    %14 = vector.load %arg11[%c0_15, %c0_16] : memref<16x16xf32, #tpu.memory_space<vmem>>, vector<16x16xf32>
    %c0_17 = arith.constant 0 : index
    %c0_18 = arith.constant 0 : index
    %15 = vector.load %arg5[%c0_17, %c0_18] : memref<32x16xbf16, #tpu.memory_space<vmem>>, vector<32x16xbf16>
    %cst_19 = arith.constant dense<0.000000e+00> : vector<16x16xf32>
    %16 = tpu.matmul %3, %15, %cst_19 {dimension_numbers = #tpu.dot_dimension_numbers<[1], [0], [0], [1], [0, 0, 1, 1], [], []>} : vector<16x32xbf16>, vector<32x16xbf16>, vector<16x16xf32> -> vector<16x16xf32>
    %17 = arith.addf %14, %16 : vector<16x16xf32>
    %c0_20 = arith.constant 0 : index
    %c0_21 = arith.constant 0 : index
    %18 = vector.load %arg11[%c0_20, %c0_21] : memref<16x16xf32, #tpu.memory_space<vmem>>, vector<16x16xf32>
    tpu.vector_store %arg11[%c0_20, %c0_21], %17 {strides = array<i32>} : memref<16x16xf32, #tpu.memory_space<vmem>>, vector<16x16xf32>,
    %c0_i32_22 = arith.constant 0 : i32
    %19 = arith.cmpi eq, %arg1, %c0_i32_22 : i32
    %20 = arith.extui %19 : i1 to i32
    %c0_i32_23 = arith.constant 0 : i32
    %21 = arith.cmpi ne, %20, %c0_i32_23 : i32
    scf.if %21 {
      %c0_24 = arith.constant 0 : index
      %c0_25 = arith.constant 0 : index
      %22 = vector.load %arg9[%c0_24, %c0_25] : memref<16x16xf32, #tpu.memory_space<vmem>>, vector<16x16xf32>
      %23 = arith.truncf %22 : vector<16x16xf32> to vector<16x16xbf16>
      %c0_26 = arith.constant 0 : index
      %c0_27 = arith.constant 0 : index
      %24 = vector.load %arg6[%c0_26, %c0_27] : memref<16x16xbf16, #tpu.memory_space<vmem>>, vector<16x16xbf16>
      tpu.vector_store %arg6[%c0_26, %c0_27], %23 {strides = array<i32>} : memref<16x16xbf16, #tpu.memory_space<vmem>>, vector<16x16xbf16>,
      %c0_28 = arith.constant 0 : index
      %c0_29 = arith.constant 0 : index
      %25 = vector.load %arg10[%c0_28, %c0_29] : memref<16x16xf32, #tpu.memory_space<vmem>>, vector<16x16xf32>
      %26 = arith.truncf %25 : vector<16x16xf32> to vector<16x16xbf16>
      %c0_30 = arith.constant 0 : index
      %c0_31 = arith.constant 0 : index
      %27 = vector.load %arg7[%c0_30, %c0_31] : memref<16x16xbf16, #tpu.memory_space<vmem>>, vector<16x16xbf16>
      tpu.vector_store %arg7[%c0_30, %c0_31], %26 {strides = array<i32>} : memref<16x16xbf16, #tpu.memory_space<vmem>>, vector<16x16xbf16>,
      %c0_32 = arith.constant 0 : index
      %c0_33 = arith.constant 0 : index
      %28 = vector.load %arg11[%c0_32, %c0_33] : memref<16x16xf32, #tpu.memory_space<vmem>>, vector<16x16xf32>
      %29 = arith.truncf %28 : vector<16x16xf32> to vector<16x16xbf16>
      %c0_34 = arith.constant 0 : index
      %c0_35 = arith.constant 0 : index
      %30 = vector.load %arg8[%c0_34, %c0_35] : memref<16x16xbf16, #tpu.memory_space<vmem>>, vector<16x16xbf16>
      tpu.vector_store %arg8[%c0_34, %c0_35], %29 {strides = array<i32>} : memref<16x16xbf16, #tpu.memory_space<vmem>>, vector<16x16xbf16>,
    } else {
    }
    return
  }
  func.func @transform_0(%arg0: i32, %arg1: i32) -> (i32, i32) {
    %c0_i32 = arith.constant 0 : i32
    return %arg0, %arg1 : i32, i32
  }
  func.func @transform_1(%arg0: i32, %arg1: i32) -> (i32, i32) {
    %c0_i32 = arith.constant 0 : i32
    %c0_i32_0 = arith.constant 0 : i32
    return %arg1, %c0_i32 : i32, i32
  }
  func.func @transform_2(%arg0: i32, %arg1: i32) -> (i32, i32) {
    %c0_i32 = arith.constant 0 : i32
    %c0_i32_0 = arith.constant 0 : i32
    return %arg1, %c0_i32 : i32, i32
  }
  func.func @transform_3(%arg0: i32, %arg1: i32) -> (i32, i32) {
    %c0_i32 = arith.constant 0 : i32
    %c0_i32_0 = arith.constant 0 : i32
    return %arg1, %c0_i32 : i32, i32
  }
  func.func @transform_4(%arg0: i32, %arg1: i32) -> (i32, i32) {
    %c0_i32 = arith.constant 0 : i32
    %c0_i32_0 = arith.constant 0 : i32
    return %arg0, %c0_i32 : i32, i32
  }
  func.func @transform_5(%arg0: i32, %arg1: i32) -> (i32, i32) {
    %c0_i32 = arith.constant 0 : i32
    %c0_i32_0 = arith.constant 0 : i32
    return %arg0, %c0_i32 : i32, i32
  }
  func.func @transform_6(%arg0: i32, %arg1: i32) -> (i32, i32) {
    %c0_i32 = arith.constant 0 : i32
    %c0_i32_0 = arith.constant 0 : i32
    return %arg0, %c0_i32 : i32, i32
  }
}

</mosaic_0001>

<bundles_post_ra>
// kernel: tpu_custom_call.1
= control target key start
LH: loop header
LB: loop body
LE: loop exit
PB: predicated region body
PF: predicated region fallthrough
CT: control target
= control target key end

     0   :  { %12 = vsyncpa [#allocation6], 0  ;;  %v461_v1 = vmov 0.0   ;;  %vm462_vm0 = vmmov 0   ;;  %vm27_vm1 = vcmask 130048   ;;  %vm59_vm2 = vcmask 261120   ;;  %s597_s0 = inlined_call_operand.vmem [shape: bf16[16,32], index: 0, kind: input, shape index: {}]   ;;  %s598_s1 = inlined_call_operand.vmem [shape: bf16[32,16], index: 1, kind: input, shape index: {}]   ;;  %s599_s2 = inlined_call_operand.vmem [shape: bf16[32,16], index: 2, kind: input, shape index: {}]   ;;  %s600_s3 = inlined_call_operand.vmem [shape: bf16[32,16], index: 3, kind: input, shape index: {}]   ;;  %s601_s4 = inlined_call_operand.hbm [shape: bf16[16,16], index: 4, kind: output, shape index: {0}]   ;;  %s602_s5 = inlined_call_operand.hbm [shape: bf16[16,16], index: 5, kind: output, shape index: {1}]   ;;  %s603_s6 = inlined_call_operand.hbm [shape: bf16[16,16], index: 6, kind: output, shape index: {2}]  }
   0x1   :  { %v384_v0 = vld [vmem:[%s598_s1] sm:$0xff]   ;;  %353 = vmatprep.subr.bf16.mxu0 %v461_v1  ;;  %v385_v2 = vld [vmem:[%s598_s1 + $0x8] sm:$0xff]   ;;  %361 = vmatprep.subr.bf16.mxu1 %v461_v1  ;;  %28 = vst.msk [vmem:[#allocation2] sm:$0xff] %vm27_vm1, %v461_v1  ;;  %29 = vst.msk [vmem:[#allocation2 + $0x8] sm:$0xff] %vm27_vm1, %v461_v1 }
   0x2   :  { %354 = vmatpush3.bf16.msra.mxu0 %v384_v0  ;;  %v386_v3 = vld [vmem:[%s599_s2] sm:$0xff]   ;;  %357 = vmatprep.mubr.msk.bf16.mxu0 %vm462_vm0, %v461_v1  ;;  %30 = vst.msk [vmem:[#allocation3] sm:$0xff] %vm27_vm1, %v461_v1  ;;  %31 = vst.msk [vmem:[#allocation3 + $0x8] sm:$0xff] %vm27_vm1, %v461_v1  ;;  %v389_v5 = vld [vmem:[%s599_s2 + $0x8] sm:$0xff]  }
   0x3   :  { %355 = vmatprep.subr.bf16.mxu0 %v461_v1  ;;  %365 = vmatprep.mubr.msk.bf16.mxu1 %vm462_vm0, %v461_v1  ;;  %v387_v4 = vld [vmem:[%s597_s0] sm:$0xff]   ;;  %32 = vst.msk [vmem:[#allocation4] sm:$0xff] %vm27_vm1, %v461_v1  ;;  %33 = vst.msk [vmem:[#allocation4 + $0x8] sm:$0xff] %vm27_vm1, %v461_v1 }
   0x4   :  { %362 = vmatpush3.bf16.msra.mxu1 %v386_v3  ;;  %v388_v6 = vld [vmem:[%s600_s3] sm:$0xff]  }
   0x5   :  { %363 = vmatprep.subr.bf16.mxu1 %v461_v1 }
   0x6   :  { %356 = vmatpush3.bf16.msra.mxu0 %v385_v2 }
   0x7   :  { %369 = vmatprep.subr.bf16.mxu0 %v461_v1 }
   0x8   :  { %13 = vsyncpa [#allocation8], 0  ;;  %364 = vmatpush3.bf16.msra.mxu1 %v389_v5  ;;  %v390_v7 = vld [vmem:[%s600_s3 + $0x8] sm:$0xff]   ;;  %v36_v8 = vld [vmem:[#allocation2] sm:$0xff]  ;;  %vm248_vm3 = vcmask 125952   ;;  %s463_s2 = smov [#allocation5]  }
   0x9   :  { %358 = vmatmul.mubr.msk.bf16.vlgmr.msra.gmra.mrb[0].mxu0 %vm59_vm2, %v387_v4  ;;  %v37_v10 = vld [vmem:[#allocation2 + $0x8] sm:$0xff]  ;;  %v109_v11 = vld [vmem:[#allocation3] sm:$0xff]  ;;  %v110_v16 = vld [vmem:[#allocation3 + $0x8] sm:$0xff]  ;;  %s280_s3 = sshll.u32 %s463_s2, 4  ;;  %s464_s9 = smov [#allocation7]   ;;  %s281_s3 = int_to_ptr.vmem [resolvable:$true] %s280_s3 }
   0xa   :  { %370 = vmatpush3.bf16.msra.mxu0 %v388_v6  ;;  %373 = vmatprep.mubr.msk.bf16.mxu0 %vm462_vm0, %v461_v1  ;;  %v172_v24 = vld [vmem:[#allocation4] sm:$0xff]  ;;  %v173_v26 = vld [vmem:[#allocation4 + $0x8] sm:$0xff]  ;;  %s292_s10 = sshll.u32 %s464_s9, 4  ;;  %s391_s11 = scalar_lea.vmem %s281_s3, 128  ;;  %s541_s10 = int_to_ptr.vmem [resolvable:$true] %s292_s10 }
   0xb   :  { %371 = vmatprep.subr.bf16.mxu0 %v461_v1  ;;  %366 = vmatmul.mubr.msk.bf16.vlgmr.msra.gmra.mrb[0].mxu1 %vm59_vm2, %v387_v4  ;;  %p392_p0 = scmp.ne.s32.totalorder %s281_s3, %s391_s11  ;;  %p396_p1 = scmp.lt.s32.totalorder %s281_s3, %s281_s3 }
   0xc   :  { %p397_p2 = scmp.lt.s32.totalorder %s391_s11, %s391_s11 }
   0xe   :  { %372 = vmatpush3.bf16.msra.mxu0 %v390_v7  ;;  %p398_p3 = por %p397_p2, %p396_p1 }
  0x10   :  { %p399_p4 = pnand %p398_p3, %p392_p0 }
  0x11   :  { %374 = vmatmul.mubr.msk.bf16.vlgmr.msra.gmra.mrb[4].mxu0 %vm59_vm2, %v387_v4 }
  0xdc   :  { %v97_v9 = vpop.f32.mrb[0].mxu0 }
  0xdd   :  { %v104_v12 = vadd.f32 %v97_v9, %v36_v8  ;;  %v359_v13 = vpop.f32.mrb[1].mxu0 }
  0xde   :  { %v100_v14 = vpop.f32.mrb[2].mxu0  ;;  %v161_v15 = vpop.f32.mrb[0].mxu1 }
  0xdf   :  { %107 = vst.msk [vmem:[#allocation2] sm:$0xff] %vm27_vm1, %v104_v12  ;;  %v105_v17 = vadd.f32 %v100_v14, %v37_v10  ;;  %v360_v18 = vpop.f32.mrb[3].mxu0  ;;  %v168_v19 = vadd.f32 %v161_v15, %v109_v11  ;;  %v367_v20 = vpop.f32.mrb[1].mxu1 }
  0xe0   :  { %v164_v21 = vpop.f32.mrb[2].mxu1 }
  0xe1   :  { %108 = vst.msk [vmem:[#allocation2 + $0x8] sm:$0xff] %vm27_vm1, %v105_v17  ;;  %170 = vst.msk [vmem:[#allocation3] sm:$0xff] %vm27_vm1, %v168_v19  ;;  %v169_v22 = vadd.f32 %v164_v21, %v110_v16  ;;  %v368_v23 = vpop.f32.mrb[3].mxu1 }
  0xe3   :  { %171 = vst.msk [vmem:[#allocation3 + $0x8] sm:$0xff] %vm27_vm1, %v169_v22 }
  0xe4   :  { %v224_v25 = vpop.f32.mrb[4].mxu0 }
  0xe5   :  { %v231_v27 = vadd.f32 %v224_v25, %v172_v24  ;;  %v375_v28 = vpop.f32.mrb[5].mxu0 }
  0xe6   :  { %v227_v29 = vpop.f32.mrb[6].mxu0  ;;  %v238_v30 = vld [vmem:[#allocation2] sm:$0xff] }
  0xe7   :  { %233 = vst.msk [vmem:[#allocation4] sm:$0xff] %vm27_vm1, %v231_v27  ;;  %v232_v31 = vadd.f32 %v227_v29, %v173_v26  ;;  %v376_v32 = vpop.f32.mrb[7].mxu0  ;;  %v338_v33 = vpack.c.bf16 %v238_v30, %v238_v30 }
  0xe8   :  { %v251_v34 = vld [vmem:[#allocation3] sm:$0xff]  ;;  %v239_v35 = vld [vmem:[#allocation2 + $0x8] sm:$0xff] }
  0xe9   :  { %234 = vst.msk [vmem:[#allocation4 + $0x8] sm:$0xff] %vm27_vm1, %v232_v31  ;;  %v340_v36 = vpack.c.bf16 %v251_v34, %v251_v34  ;;  %v339_v37 = vpack.c.bf16 %v239_v35, %v239_v35 }
  0xea   :  { %249 = vst.msk [vmem:[#allocation5] sm:$0xf] %vm248_vm3, %v338_v33  ;;  %v252_v38 = vld [vmem:[#allocation3 + $0x8] sm:$0xff] }
  0xeb   :  { %v341_v39 = vpack.c.bf16 %v252_v38, %v252_v38  ;;  %261 = vst.msk [vmem:[#allocation7] sm:$0xf] %vm248_vm3, %v340_v36  ;;  %250 = vst.msk [vmem:[#allocation5 + $0x4] sm:$0xf] %vm248_vm3, %v339_v37 }
  0xec   :  { %402 = shalt.err (!%p399_p4)
}
  0xed   :  { %s403_s14 = scalar_lea.hbm %s601_s4, 128 }
  0xee   :  { %p404_p5 = scmp.ne.s32.totalorder %s601_s4, %s403_s14  ;;  %p407_p6 = scmp.lt.u32.totalorder %s403_s14, %s601_s4 }
  0xf0   :  { %p409_p7 = pnand %p407_p6, %p404_p5 }
  0xf2   :  { %412 = shalt.err (!%p409_p7)
}
  0xf3   :  { %s465_s19 = smov 64   ;;  %s466_s20 = smov 4   ;;  %262 = vst.msk [vmem:[#allocation7 + $0x4] sm:$0xf] %vm248_vm3, %v341_v39 }
  0xf4   :  { %286 = dma.vmem_to_hbm [thread:$0]  %s281_s3, 128, %s601_s4, [#allocation6], %s465_s19, %s465_s19, %s466_s20  }
  0xf5   :  { %s467_s23 = smov [#allocation9]   ;;  %s413_s25 = scalar_lea.vmem %s541_s10, 128 }
  0xf6   :  { %s304_s24 = sshll.u32 %s467_s23, 4  ;;  %p414_p8 = scmp.ne.s32.totalorder %s541_s10, %s413_s25  ;;  %s305_s24 = int_to_ptr.vmem [resolvable:$true] %s304_s24 }
  0xf7   :  { %p418_p9 = scmp.lt.s32.totalorder %s541_s10, %s541_s10  ;;  %p419_p10 = scmp.lt.s32.totalorder %s413_s25, %s413_s25 }
  0xf9   :  { %p420_p11 = por %p419_p10, %p418_p9 }
  0xfb   :  { %p421_p12 = pnand %p420_p11, %p414_p8 }
  0xfd   :  { %424 = shalt.err (!%p421_p12)
}
  0xfe   :  { %s425_s28 = scalar_lea.hbm %s602_s5, 128 }
  0xff   :  { %p426_p13 = scmp.ne.s32.totalorder %s602_s5, %s425_s28  ;;  %p429_p0 = scmp.lt.u32.totalorder %s425_s28, %s602_s5 }
 0x101   :  { %p431_p1 = pnand %p429_p0, %p426_p13 }
 0x103   :  { %434 = shalt.err (!%p431_p1)
}
 0x104   :  { %298 = dma.vmem_to_hbm [thread:$0]  %s541_s10, 128, %s602_s5, [#allocation8], %s465_s19, %s465_s19, %s466_s20   ;;  %v263_v40 = vld [vmem:[#allocation4] sm:$0xff]  ;;  %v264_v42 = vld [vmem:[#allocation4 + $0x8] sm:$0xff] }
 0x105   :  { %v342_v41 = vpack.c.bf16 %v263_v40, %v263_v40  ;;  %v343_v43 = vpack.c.bf16 %v264_v42, %v264_v42  ;;  %s435_s8 = scalar_lea.vmem %s305_s24, 128  ;;  %p440_p3 = scmp.lt.s32.totalorder %s305_s24, %s305_s24 }
 0x106   :  { %p436_p2 = scmp.ne.s32.totalorder %s305_s24, %s435_s8  ;;  %p441_p4 = scmp.lt.s32.totalorder %s435_s8, %s435_s8 }
 0x107   :  { %273 = vst.msk [vmem:[#allocation9] sm:$0xf] %vm248_vm3, %v342_v41  ;;  %274 = vst.msk [vmem:[#allocation9 + $0x4] sm:$0xf] %vm248_vm3, %v343_v43 }
 0x108   :  { %p442_p5 = por %p441_p4, %p440_p3 }
 0x10a   :  { %p443_p6 = pnand %p442_p5, %p436_p2 }
 0x10c   :  { %446 = shalt.err (!%p443_p6)
}
 0x10d   :  { %s447_s5 = scalar_lea.hbm %s603_s6, 128 }
 0x10e   :  { %p448_p7 = scmp.ne.s32.totalorder %s603_s6, %s447_s5  ;;  %p451_p8 = scmp.lt.u32.totalorder %s447_s5, %s603_s6 }
 0x110   :  { %p453_p9 = pnand %p451_p8, %p448_p7 }
 0x112   :  { %456 = shalt.err (!%p453_p9)
}
 0x113   :  { %310 = dma.vmem_to_hbm [thread:$0]  %s305_s24, 128, %s603_s6, [#allocation8], %s465_s19, %s465_s19, %s466_s20  }
 0x114   :  { %457 = dma.done.wait [#allocation6], 128  }
 0x115   :  { %458 = vsyncadd [#allocation6], 4294967168 }
 0x116   :  { %459 = dma.done.wait [#allocation8], 256  }
 0x117   :  { %460 = vsyncadd [#allocation8], 4294967040 }
 0x118   :  { %320 = vsyncpa [#allocation6], 1 }
 0x119   :  { %321 = vsyncpa [#allocation8], 1 }

</bundles_post_ra>
